<compile_context>
chip_gen: v7x
topology: tpu7x:2x2x1
jax: 0.10.0
libtpu: 0.0.40
codegen_flags: <defaults>
</compile_context>

<pallas_src>
import functools

import jax
import jax.numpy as jnp
from jax import lax
from jax.experimental import pallas as pl
from jax.experimental.pallas import tpu as pltpu


def _round_up(x, m):
    return (x + m - 1) // m * m


def _cdiv(a, b):
    return -(-a // b)


# ----------------------------- fused Pallas kernel ---------------------------
def _encoder_kernel(x_ref, w1_ref, b1_ref, w2_ref, b2_ref, w3_ref, b3_ref,
                    w4_ref, b4_ref, o_ref, *, sw):
    """Whole encoder for one batch tile.

    x_ref : (BT*IMG_STRIDE, 4*Cin) bf16 -- raw space-to-depth canvas
                                           (normalization folded into w1/b1)
    wK_ref: (K, 32) bf16                -- tap-packed (im2col) weight matrix
    bK_ref: (1, 32) f32
    o_ref : (BT*IMG_STRIDE, 32) bf16    -- layer-4 output canvas (valid region at row 0)
    """

    def conv_relu(canvas, w_ref, b_ref, k, n_in):
        """Stride-1 valid k x k conv over a flat canvas with row stride `sw`,
        expressed as one K-packed (im2col-in-VMEM) MXU matmul."""
        moff = (k - 1) * sw + (k - 1)            # largest tap offset
        n_out = n_in - moff
        taps = [canvas[kh * sw + kw:kh * sw + kw + n_out, :]
                for kh in range(k) for kw in range(k)]
        slab = jnp.concatenate(taps, axis=1)     # (n_out, k*k*cin) bf16
        acc = jnp.dot(slab, w_ref[...], preferred_element_type=jnp.float32)
        h = jnp.maximum(acc + b_ref[...], 0.0)   # bias + ReLU in f32
        return h.astype(jnp.bfloat16), n_out     # bf16 inter-layer canvas

    n = x_ref.shape[0]
    h, n = conv_relu(x_ref[...], w1_ref, b1_ref, 2, n)   # layer 1 (stride-2 via s2d)
    h, n = conv_relu(h, w2_ref, b2_ref, 3, n)            # layer 2
    h, n = conv_relu(h, w3_ref, b3_ref, 3, n)            # layer 3
    h, n = conv_relu(h, w4_ref, b4_ref, 3, n)            # layer 4
    o_ref[0:n, :] = h                                    # valid rows, stored once
    o_ref[n:, :] = jnp.zeros((o_ref.shape[0] - n, o_ref.shape[1]), o_ref.dtype)


# ------------------------------ glue helpers ---------------------------------
def _space_to_depth_weight(w1):
    """(3,3,Cin,Cout) stride-2 conv weight -> (4, 4*Cin, Cout) taps of a 2x2 stride-1
    conv acting on the space-to-depth input (phase layout (ph, pw, ci))."""
    _, _, cin, cout = w1.shape
    w1s = jnp.zeros((2, 2, 2, 2, cin, cout), w1.dtype)   # (dh, dw, ph, pw, ci, co)
    for dh in range(2):
        for ph in range(2):
            kh = 2 * dh + ph
            if kh >= 3:
                continue
            for dw in range(2):
                for pw in range(2):
                    kw = 2 * dw + pw
                    if kw >= 3:
                        continue
                    w1s = w1s.at[dh, dw, ph, pw].set(w1[kh, kw])
    return w1s.reshape(4, 4 * cin, cout)                 # tap = dh*2 + dw


# ------------------------------ Encoder model --------------------------------
def init_encoder_params(obs_shape, key):
    cin = obs_shape[0]
    dims = [(cin, 32), (32, 32), (32, 32), (32, 32)]
    params = {}
    for idx, (ci, co) in enumerate(dims, start=1):
        key, kw_, kb_ = jax.random.split(key, 3)
        params[f"w{idx}"] = jax.random.normal(kw_, (3, 3, ci, co), jnp.float32) * 0.05
        params[f"b{idx}"] = jax.random.normal(kb_, (co,), jnp.float32) * 0.01
    return params


def encoder_forward(obs_nchw, params, *, bt=None):
    """obs_nchw: float32 (B, C, H, W), raw pixel values in [0, 255].
    Returns (B, 32*OH*OW) float32 in torch's NCHW flatten order."""
    B, Cin, H, W = obs_nchw.shape
    assert H >= 15 and W >= 15, "network needs at least 15x15 spatial input"

    x = jnp.transpose(obs_nchw, (0, 2, 3, 1))            # NCHW -> NHWC (tiny raw input)
    Hp, Wp = _round_up(H, 2), _round_up(W, 2)
    if (Hp, Wp) != (H, W):                               # pad to even; padded row/col
        x = jnp.pad(x, ((0, 0), (0, Hp - H), (0, Wp - W), (0, 0)))  # never read
    SH, SW = Hp // 2, Wp // 2

    # space-to-depth: (B,H,W,C) -> (B, SH*SW, 4C); stride-2 3x3 == stride-1 2x2 conv
    x = x.reshape(B, SH, 2, SW, 2, Cin).transpose(0, 1, 3, 2, 4, 5)
    x = x.reshape(B, SH * SW, 4 * Cin)

    img_stride = _round_up(SH * SW, 16)                  # per-image canvas row stride
    if img_stride != SH * SW:                            # (16-aligned for bf16 blocks)
        x = jnp.pad(x, ((0, 0), (0, img_stride - SH * SW), (0, 0)))

    # Batch tile from a VMEM working-set budget (~14 MiB of the 32 MiB scoped limit):
    # per canvas row: double-buffered bf16 input + bf16 (9*32) im2col slab
    # + ~2 live bf16 canvases + f32 accumulator + double-buffered bf16 output.
    if bt is None:
        bytes_per_row = 2 * 2 * (4 * Cin) + 2 * 9 * 32 + 2 * 2 * 32 + 4 * 32 + 2 * 2 * 32
        bt = max(1, min(B, (14 << 20) // (img_stride * bytes_per_row)))
        if B >= 2:
            bt = min(bt, _cdiv(B, 2))                    # >=2 grid steps (megacore)
    nbt = _cdiv(B, bt)
    b_pad = nbt * bt
    if b_pad != B:
        x = jnp.pad(x, ((0, b_pad - B), (0, 0), (0, 0)))
    # raw pixels are integers 0..255 -> exact in bf16; normalization folded into w1/b1
    x = x.reshape(b_pad * img_stride, 4 * Cin).astype(jnp.bfloat16)

    # Fold `obs/255 - 0.5` into layer-1 weight/bias, then pack every layer's taps
    # along the contraction dim (K) so each layer is a single MXU matmul.
    w1f = params["w1"].astype(jnp.float32)
    b1f = params["b1"].astype(jnp.float32) - 0.5 * jnp.sum(w1f, axis=(0, 1, 2))
    w1 = _space_to_depth_weight(w1f / 255.0).reshape(4 * 4 * Cin, 32).astype(jnp.bfloat16)
    w2 = params["w2"].reshape(9 * 32, 32).astype(jnp.bfloat16)
    w3 = params["w3"].reshape(9 * 32, 32).astype(jnp.bfloat16)
    w4 = params["w4"].reshape(9 * 32, 32).astype(jnp.bfloat16)
    b1 = b1f.reshape(1, 32).astype(jnp.float32)
    b2 = params["b2"].reshape(1, 32).astype(jnp.float32)
    b3 = params["b3"].reshape(1, 32).astype(jnp.float32)
    b4 = params["b4"].reshape(1, 32).astype(jnp.float32)

    rows = bt * img_stride

    def full(a):                                         # VMEM-resident full block
        return pl.BlockSpec(a.shape, lambda i: (0, 0))

    out = pl.pallas_call(
        functools.partial(_encoder_kernel, sw=SW),
        out_shape=jax.ShapeDtypeStruct((b_pad * img_stride, 32), jnp.bfloat16),
        grid=(nbt,),
        in_specs=[
            pl.BlockSpec((rows, 4 * Cin), lambda i: (i, 0)),
            full(w1), full(b1), full(w2), full(b2),
            full(w3), full(b3), full(w4), full(b4),
        ],
        out_specs=pl.BlockSpec((rows, 32), lambda i: (i, 0)),
        compiler_params=pltpu.CompilerParams(
            dimension_semantics=("parallel",),
            vmem_limit_bytes=32 * 1024 * 1024),
    )(x, w1, b1, w2, b2, w3, b3, w4, b4)

    # decode: crop the valid canvas region and flatten in torch's NCHW order
    OH = SH - 1 - 2 * 3                                  # 2x2 conv + three 3x3 convs
    OW = SW - 1 - 2 * 3
    h = out.reshape(b_pad, img_stride, 32)[:B, :SH * SW, :]
    h = h.reshape(B, SH, SW, 32)[:, :OH, :OW, :]
    h = jnp.transpose(h, (0, 3, 1, 2))                   # NHWC -> NCHW
    return h.reshape(B, -1).astype(jnp.float32)          # == torch h.view(B, -1)


# --------------------------- pure-JAX reference -------------------------------
def encoder_reference(obs_nchw, params):
    x = jnp.transpose(obs_nchw, (0, 2, 3, 1)) / 255.0 - 0.5
    strides = [2, 1, 1, 1]
    for idx, s in enumerate(strides, start=1):
        x = lax.conv_general_dilated(
            x, params[f"w{idx}"], window_strides=(s, s), padding="VALID",
            dimension_numbers=("NHWC", "HWIO", "NHWC"))
        x = jnp.maximum(x + params[f"b{idx}"], 0.0)
    x = jnp.transpose(x, (0, 3, 1, 2))
    return x.reshape(x.shape[0], -1)


# ----------------------------------- main --------------------------------------
if __name__ == "__main__":
    obs_shape = (4, 16, 16)                              # (C, H, W)
    batch = 2

    key = jax.random.PRNGKey(0)
    key_obs, key_params = jax.random.split(key)
    # integer pixel values (uint8-sourced observations) -> exact in bf16
    obs = jnp.round(jax.random.uniform(key_obs, (batch, *obs_shape), jnp.float32,
                                       minval=0.0, maxval=255.0))
    params = init_encoder_params(obs_shape, key_params)

    fwd = jax.jit(encoder_forward)
    h = jax.block_until_ready(fwd(obs, params))

    h_ref = encoder_reference(obs, params)
    assert h.shape == (batch, 32 * 1 * 1), h.shape       # 16x16 -> 7 -> 5 -> 3 -> 1
    # bf16 MXU matmuls + bf16 canvases -> loosened tolerance vs f32 reference.
    max_err = float(jnp.max(jnp.abs(h - h_ref)))
    assert jnp.allclose(h, h_ref, rtol=2e-2, atol=2e-2), max_err

    print("KERNEL_OK")
</pallas_src>

<mosaic_0001>
module attributes {stable_mosaic.version = 11 : i64} {
  func.func @_encoder_kernel(%arg0: i32, %arg1: memref<64x16xbf16, #tpu.memory_space<vmem>>, %arg2: memref<64x32xbf16, #tpu.memory_space<vmem>>, %arg3: memref<1x32xf32, #tpu.memory_space<vmem>>, %arg4: memref<288x32xbf16, #tpu.memory_space<vmem>>, %arg5: memref<1x32xf32, #tpu.memory_space<vmem>>, %arg6: memref<288x32xbf16, #tpu.memory_space<vmem>>, %arg7: memref<1x32xf32, #tpu.memory_space<vmem>>, %arg8: memref<288x32xbf16, #tpu.memory_space<vmem>>, %arg9: memref<1x32xf32, #tpu.memory_space<vmem>>, %arg10: memref<64x32xbf16, #tpu.memory_space<vmem>>) attributes {dimension_semantics = [#tpu.dimension_semantics<parallel>], iteration_bounds = array<i64: 2>, scalar_prefetch = 0 : i64, scratch_operands = 0 : i64, tpu.core_type = #tpu.core_type<tc>, window_params = [{transform_indices = @transform_0, window_bounds = array<i64: 64, 16>}, {pipeline_mode = #tpu.pipeline_mode<synchronous>, transform_indices = @transform_1, window_bounds = array<i64: 64, 32>}, {pipeline_mode = #tpu.pipeline_mode<synchronous>, transform_indices = @transform_2, window_bounds = array<i64: 1, 32>}, {pipeline_mode = #tpu.pipeline_mode<synchronous>, transform_indices = @transform_3, window_bounds = array<i64: 288, 32>}, {pipeline_mode = #tpu.pipeline_mode<synchronous>, transform_indices = @transform_4, window_bounds = array<i64: 1, 32>}, {pipeline_mode = #tpu.pipeline_mode<synchronous>, transform_indices = @transform_5, window_bounds = array<i64: 288, 32>}, {pipeline_mode = #tpu.pipeline_mode<synchronous>, transform_indices = @transform_6, window_bounds = array<i64: 1, 32>}, {pipeline_mode = #tpu.pipeline_mode<synchronous>, transform_indices = @transform_7, window_bounds = array<i64: 288, 32>}, {pipeline_mode = #tpu.pipeline_mode<synchronous>, transform_indices = @transform_8, window_bounds = array<i64: 1, 32>}, {transform_indices = @transform_9, window_bounds = array<i64: 64, 32>}]} {
    %c0 = arith.constant 0 : index
    %c0_0 = arith.constant 0 : index
    %0 = vector.load %arg1[%c0, %c0_0] : memref<64x16xbf16, #tpu.memory_space<vmem>>, vector<64x16xbf16>
    %1 = vector.extract_strided_slice %0 {offsets = [0, 0], sizes = [55, 16], strides = [1, 1]} : vector<64x16xbf16> to vector<55x16xbf16>
    %2 = vector.extract_strided_slice %0 {offsets = [1, 0], sizes = [55, 16], strides = [1, 1]} : vector<64x16xbf16> to vector<55x16xbf16>
    %3 = vector.extract_strided_slice %0 {offsets = [8, 0], sizes = [55, 16], strides = [1, 1]} : vector<64x16xbf16> to vector<55x16xbf16>
    %4 = vector.extract_strided_slice %0 {offsets = [9, 0], sizes = [55, 16], strides = [1, 1]} : vector<64x16xbf16> to vector<55x16xbf16>
    %5 = tpu.concatenate %1, %2, %3, %4 in 1 : vector<55x16xbf16>, vector<55x16xbf16>, vector<55x16xbf16>, vector<55x16xbf16> -> vector<55x64xbf16>
    %c0_1 = arith.constant 0 : index
    %c0_2 = arith.constant 0 : index
    %6 = vector.load %arg2[%c0_1, %c0_2] : memref<64x32xbf16, #tpu.memory_space<vmem>>, vector<64x32xbf16>
    %cst = arith.constant dense<0.000000e+00> : vector<55x32xf32>
    %7 = tpu.matmul %5, %6, %cst {dimension_numbers = #tpu.dot_dimension_numbers<[1], [0], [0], [1], [0, 0, 1, 1], [], []>} : vector<55x64xbf16>, vector<64x32xbf16>, vector<55x32xf32> -> vector<55x32xf32>
    %c0_3 = arith.constant 0 : index
    %c0_4 = arith.constant 0 : index
    %8 = vector.load %arg3[%c0_3, %c0_4] : memref<1x32xf32, #tpu.memory_space<vmem>>, vector<1x32xf32>
    %9 = vector.broadcast %8 : vector<1x32xf32> to vector<55x32xf32>
    %10 = arith.addf %7, %9 : vector<55x32xf32>
    %cst_5 = arith.constant 0.000000e+00 : f32
    %11 = vector.broadcast %cst_5 : f32 to vector<55x32xf32>
    %12 = arith.maximumf %10, %11 : vector<55x32xf32>
    %13 = arith.truncf %12 : vector<55x32xf32> to vector<55x32xbf16>
    %14 = vector.extract_strided_slice %13 {offsets = [0, 0], sizes = [37, 32], strides = [1, 1]} : vector<55x32xbf16> to vector<37x32xbf16>
    %15 = vector.extract_strided_slice %13 {offsets = [1, 0], sizes = [37, 32], strides = [1, 1]} : vector<55x32xbf16> to vector<37x32xbf16>
    %16 = vector.extract_strided_slice %13 {offsets = [2, 0], sizes = [37, 32], strides = [1, 1]} : vector<55x32xbf16> to vector<37x32xbf16>
    %17 = vector.extract_strided_slice %13 {offsets = [8, 0], sizes = [37, 32], strides = [1, 1]} : vector<55x32xbf16> to vector<37x32xbf16>
    %18 = vector.extract_strided_slice %13 {offsets = [9, 0], sizes = [37, 32], strides = [1, 1]} : vector<55x32xbf16> to vector<37x32xbf16>
    %19 = vector.extract_strided_slice %13 {offsets = [10, 0], sizes = [37, 32], strides = [1, 1]} : vector<55x32xbf16> to vector<37x32xbf16>
    %20 = vector.extract_strided_slice %13 {offsets = [16, 0], sizes = [37, 32], strides = [1, 1]} : vector<55x32xbf16> to vector<37x32xbf16>
    %21 = vector.extract_strided_slice %13 {offsets = [17, 0], sizes = [37, 32], strides = [1, 1]} : vector<55x32xbf16> to vector<37x32xbf16>
    %22 = vector.extract_strided_slice %13 {offsets = [18, 0], sizes = [37, 32], strides = [1, 1]} : vector<55x32xbf16> to vector<37x32xbf16>
    %23 = tpu.concatenate %14, %15, %16, %17, %18, %19, %20, %21, %22 in 1 : vector<37x32xbf16>, vector<37x32xbf16>, vector<37x32xbf16>, vector<37x32xbf16>, vector<37x32xbf16>, vector<37x32xbf16>, vector<37x32xbf16>, vector<37x32xbf16>, vector<37x32xbf16> -> vector<37x288xbf16>
    %c0_6 = arith.constant 0 : index
    %c0_7 = arith.constant 0 : index
    %24 = vector.load %arg4[%c0_6, %c0_7] : memref<288x32xbf16, #tpu.memory_space<vmem>>, vector<288x32xbf16>
    %cst_8 = arith.constant dense<0.000000e+00> : vector<37x32xf32>
    %25 = tpu.matmul %23, %24, %cst_8 {dimension_numbers = #tpu.dot_dimension_numbers<[1], [0], [0], [1], [0, 0, 1, 1], [], []>} : vector<37x288xbf16>, vector<288x32xbf16>, vector<37x32xf32> -> vector<37x32xf32>
    %c0_9 = arith.constant 0 : index
    %c0_10 = arith.constant 0 : index
    %26 = vector.load %arg5[%c0_9, %c0_10] : memref<1x32xf32, #tpu.memory_space<vmem>>, vector<1x32xf32>
    %27 = vector.broadcast %26 : vector<1x32xf32> to vector<37x32xf32>
    %28 = arith.addf %25, %27 : vector<37x32xf32>
    %cst_11 = arith.constant 0.000000e+00 : f32
    %29 = vector.broadcast %cst_11 : f32 to vector<37x32xf32>
    %30 = arith.maximumf %28, %29 : vector<37x32xf32>
    %31 = arith.truncf %30 : vector<37x32xf32> to vector<37x32xbf16>
    %32 = vector.extract_strided_slice %31 {offsets = [0, 0], sizes = [19, 32], strides = [1, 1]} : vector<37x32xbf16> to vector<19x32xbf16>
    %33 = vector.extract_strided_slice %31 {offsets = [1, 0], sizes = [19, 32], strides = [1, 1]} : vector<37x32xbf16> to vector<19x32xbf16>
    %34 = vector.extract_strided_slice %31 {offsets = [2, 0], sizes = [19, 32], strides = [1, 1]} : vector<37x32xbf16> to vector<19x32xbf16>
    %35 = vector.extract_strided_slice %31 {offsets = [8, 0], sizes = [19, 32], strides = [1, 1]} : vector<37x32xbf16> to vector<19x32xbf16>
    %36 = vector.extract_strided_slice %31 {offsets = [9, 0], sizes = [19, 32], strides = [1, 1]} : vector<37x32xbf16> to vector<19x32xbf16>
    %37 = vector.extract_strided_slice %31 {offsets = [10, 0], sizes = [19, 32], strides = [1, 1]} : vector<37x32xbf16> to vector<19x32xbf16>
    %38 = vector.extract_strided_slice %31 {offsets = [16, 0], sizes = [19, 32], strides = [1, 1]} : vector<37x32xbf16> to vector<19x32xbf16>
    %39 = vector.extract_strided_slice %31 {offsets = [17, 0], sizes = [19, 32], strides = [1, 1]} : vector<37x32xbf16> to vector<19x32xbf16>
    %40 = vector.extract_strided_slice %31 {offsets = [18, 0], sizes = [19, 32], strides = [1, 1]} : vector<37x32xbf16> to vector<19x32xbf16>
    %41 = tpu.concatenate %32, %33, %34, %35, %36, %37, %38, %39, %40 in 1 : vector<19x32xbf16>, vector<19x32xbf16>, vector<19x32xbf16>, vector<19x32xbf16>, vector<19x32xbf16>, vector<19x32xbf16>, vector<19x32xbf16>, vector<19x32xbf16>, vector<19x32xbf16> -> vector<19x288xbf16>
    %c0_12 = arith.constant 0 : index
    %c0_13 = arith.constant 0 : index
    %42 = vector.load %arg6[%c0_12, %c0_13] : memref<288x32xbf16, #tpu.memory_space<vmem>>, vector<288x32xbf16>
    %cst_14 = arith.constant dense<0.000000e+00> : vector<19x32xf32>
    %43 = tpu.matmul %41, %42, %cst_14 {dimension_numbers = #tpu.dot_dimension_numbers<[1], [0], [0], [1], [0, 0, 1, 1], [], []>} : vector<19x288xbf16>, vector<288x32xbf16>, vector<19x32xf32> -> vector<19x32xf32>
    %c0_15 = arith.constant 0 : index
    %c0_16 = arith.constant 0 : index
    %44 = vector.load %arg7[%c0_15, %c0_16] : memref<1x32xf32, #tpu.memory_space<vmem>>, vector<1x32xf32>
    %45 = vector.broadcast %44 : vector<1x32xf32> to vector<19x32xf32>
    %46 = arith.addf %43, %45 : vector<19x32xf32>
    %cst_17 = arith.constant 0.000000e+00 : f32
    %47 = vector.broadcast %cst_17 : f32 to vector<19x32xf32>
    %48 = arith.maximumf %46, %47 : vector<19x32xf32>
    %49 = arith.truncf %48 : vector<19x32xf32> to vector<19x32xbf16>
    %50 = vector.extract_strided_slice %49 {offsets = [0, 0], sizes = [1, 32], strides = [1, 1]} : vector<19x32xbf16> to vector<1x32xbf16>
    %51 = vector.extract_strided_slice %49 {offsets = [1, 0], sizes = [1, 32], strides = [1, 1]} : vector<19x32xbf16> to vector<1x32xbf16>
    %52 = vector.extract_strided_slice %49 {offsets = [2, 0], sizes = [1, 32], strides = [1, 1]} : vector<19x32xbf16> to vector<1x32xbf16>
    %53 = vector.extract_strided_slice %49 {offsets = [8, 0], sizes = [1, 32], strides = [1, 1]} : vector<19x32xbf16> to vector<1x32xbf16>
    %54 = vector.extract_strided_slice %49 {offsets = [9, 0], sizes = [1, 32], strides = [1, 1]} : vector<19x32xbf16> to vector<1x32xbf16>
    %55 = vector.extract_strided_slice %49 {offsets = [10, 0], sizes = [1, 32], strides = [1, 1]} : vector<19x32xbf16> to vector<1x32xbf16>
    %56 = vector.extract_strided_slice %49 {offsets = [16, 0], sizes = [1, 32], strides = [1, 1]} : vector<19x32xbf16> to vector<1x32xbf16>
    %57 = vector.extract_strided_slice %49 {offsets = [17, 0], sizes = [1, 32], strides = [1, 1]} : vector<19x32xbf16> to vector<1x32xbf16>
    %58 = vector.extract_strided_slice %49 {offsets = [18, 0], sizes = [1, 32], strides = [1, 1]} : vector<19x32xbf16> to vector<1x32xbf16>
    %59 = tpu.concatenate %50, %51, %52, %53, %54, %55, %56, %57, %58 in 1 : vector<1x32xbf16>, vector<1x32xbf16>, vector<1x32xbf16>, vector<1x32xbf16>, vector<1x32xbf16>, vector<1x32xbf16>, vector<1x32xbf16>, vector<1x32xbf16>, vector<1x32xbf16> -> vector<1x288xbf16>
    %c0_18 = arith.constant 0 : index
    %c0_19 = arith.constant 0 : index
    %60 = vector.load %arg8[%c0_18, %c0_19] : memref<288x32xbf16, #tpu.memory_space<vmem>>, vector<288x32xbf16>
    %cst_20 = arith.constant dense<0.000000e+00> : vector<1x32xf32>
    %61 = tpu.matmul %59, %60, %cst_20 {dimension_numbers = #tpu.dot_dimension_numbers<[1], [0], [0], [1], [0, 0, 1, 1], [], []>} : vector<1x288xbf16>, vector<288x32xbf16>, vector<1x32xf32> -> vector<1x32xf32>
    %c0_21 = arith.constant 0 : index
    %c0_22 = arith.constant 0 : index
    %62 = vector.load %arg9[%c0_21, %c0_22] : memref<1x32xf32, #tpu.memory_space<vmem>>, vector<1x32xf32>
    %63 = arith.addf %61, %62 : vector<1x32xf32>
    %cst_23 = arith.constant 0.000000e+00 : f32
    %64 = vector.broadcast %cst_23 : f32 to vector<1x32xf32>
    %65 = arith.maximumf %63, %64 : vector<1x32xf32>
    %66 = arith.truncf %65 : vector<1x32xf32> to vector<1x32xbf16>
    %c0_24 = arith.constant 0 : index
    %c0_25 = arith.constant 0 : index
    %67 = vector.load %arg10[%c0_24, %c0_25] : memref<64x32xbf16, #tpu.memory_space<vmem>>, vector<1x32xbf16>
    tpu.vector_store %arg10[%c0_24, %c0_25], %66 {strides = array<i32>} : memref<64x32xbf16, #tpu.memory_space<vmem>>, vector<1x32xbf16>,
    %cst_26 = arith.constant 0.000000e+00 : bf16
    %68 = vector.broadcast %cst_26 : bf16 to vector<63x32xbf16>
    %c1 = arith.constant 1 : index
    %c0_27 = arith.constant 0 : index
    %69 = vector.load %arg10[%c1, %c0_27] : memref<64x32xbf16, #tpu.memory_space<vmem>>, vector<63x32xbf16>
    tpu.vector_store %arg10[%c1, %c0_27], %68 {strides = array<i32>} : memref<64x32xbf16, #tpu.memory_space<vmem>>, vector<63x32xbf16>,
    return
  }
  func.func @transform_0(%arg0: i32) -> (i32, i32) {
    %c0_i32 = arith.constant 0 : i32
    %c0_i32_0 = arith.constant 0 : i32
    return %arg0, %c0_i32 : i32, i32
  }
  func.func @transform_1(%arg0: i32) -> (i32, i32) {
    %c0_i32 = arith.constant 0 : i32
    %c0_i32_0 = arith.constant 0 : i32
    %c0_i32_1 = arith.constant 0 : i32
    return %c0_i32, %c0_i32_0 : i32, i32
  }
  func.func @transform_2(%arg0: i32) -> (i32, i32) {
    %c0_i32 = arith.constant 0 : i32
    %c0_i32_0 = arith.constant 0 : i32
    %c0_i32_1 = arith.constant 0 : i32
    return %c0_i32, %c0_i32_0 : i32, i32
  }
  func.func @transform_3(%arg0: i32) -> (i32, i32) {
    %c0_i32 = arith.constant 0 : i32
    %c0_i32_0 = arith.constant 0 : i32
    %c0_i32_1 = arith.constant 0 : i32
    return %c0_i32, %c0_i32_0 : i32, i32
  }
  func.func @transform_4(%arg0: i32) -> (i32, i32) {
    %c0_i32 = arith.constant 0 : i32
    %c0_i32_0 = arith.constant 0 : i32
    %c0_i32_1 = arith.constant 0 : i32
    return %c0_i32, %c0_i32_0 : i32, i32
  }
  func.func @transform_5(%arg0: i32) -> (i32, i32) {
    %c0_i32 = arith.constant 0 : i32
    %c0_i32_0 = arith.constant 0 : i32
    %c0_i32_1 = arith.constant 0 : i32
    return %c0_i32, %c0_i32_0 : i32, i32
  }
  func.func @transform_6(%arg0: i32) -> (i32, i32) {
    %c0_i32 = arith.constant 0 : i32
    %c0_i32_0 = arith.constant 0 : i32
    %c0_i32_1 = arith.constant 0 : i32
    return %c0_i32, %c0_i32_0 : i32, i32
  }
  func.func @transform_7(%arg0: i32) -> (i32, i32) {
    %c0_i32 = arith.constant 0 : i32
    %c0_i32_0 = arith.constant 0 : i32
    %c0_i32_1 = arith.constant 0 : i32
    return %c0_i32, %c0_i32_0 : i32, i32
  }
  func.func @transform_8(%arg0: i32) -> (i32, i32) {
    %c0_i32 = arith.constant 0 : i32
    %c0_i32_0 = arith.constant 0 : i32
    %c0_i32_1 = arith.constant 0 : i32
    return %c0_i32, %c0_i32_0 : i32, i32
  }
  func.func @transform_9(%arg0: i32) -> (i32, i32) {
    %c0_i32 = arith.constant 0 : i32
    %c0_i32_0 = arith.constant 0 : i32
    return %arg0, %c0_i32 : i32, i32
  }
}

</mosaic_0001>

<bundles_post_ra>
// kernel: encoder_forward.1
= control target key start
LH: loop header
LB: loop body
LE: loop exit
PB: predicated region body
PF: predicated region fallthrough
CT: control target
= control target key end

     0   :  { %s2127_s30 = smov 0   ;;  %s2559_s0 = inlined_call_operand.vmem [shape: bf16[128,16], index: 0, kind: input, shape index: {}]   ;;  %s2560_s1 = inlined_call_operand.vmem [shape: bf16[64,32], index: 1, kind: input, shape index: {}]   ;;  %s2561_s2 = inlined_call_operand.vmem [shape: f32[1,32], index: 2, kind: input, shape index: {}]   ;;  %s2562_s3 = inlined_call_operand.vmem [shape: bf16[288,32], index: 3, kind: input, shape index: {}]   ;;  %s2563_s4 = inlined_call_operand.vmem [shape: f32[1,32], index: 4, kind: input, shape index: {}]   ;;  %s2564_s5 = inlined_call_operand.vmem [shape: bf16[288,32], index: 5, kind: input, shape index: {}]   ;;  %s2565_s6 = inlined_call_operand.vmem [shape: f32[1,32], index: 6, kind: input, shape index: {}]   ;;  %s2566_s7 = inlined_call_operand.vmem [shape: bf16[288,32], index: 7, kind: input, shape index: {}]   ;;  %s2567_s8 = inlined_call_operand.vmem [shape: f32[1,32], index: 8, kind: input, shape index: {}]   ;;  %s2568_s9 = inlined_call_operand.vmem [shape: bf16[128,32], index: 9, kind: output, shape index: {}]  }
   0x1 LB: > { %s1737_s10 = sadd.s32 4294967295, %s2067_s30   ;;  %p1741_p0 = scmp.ge.s32.totalorder %s2067_s30, 1  ;;  %s2067_s30 = sphi %s2127_s30, %s19_s30  }
   0x2   : > { %p288_p1 = scmp.lt.s32.totalorder %s2067_s30, 3 }
   0x4   : > { %p289_p2 = pnand %p1741_p0, %p288_p1 }
   0x5   : > { %s1742_s11 = sshll.u32 (!%p289_p2), %s1737_s10, 3  ;;  %v2003_v0 = vld [vmem:[%s2560_s1] sm:$0xff] (!%p289_p2)   ;;  %v2004_v1 = vld [vmem:[%s2560_s1 + $0x8] sm:$0xff] (!%p289_p2)   ;;  %v2005_v2 = vld [vmem:[%s2560_s1 + $0x10] sm:$0xff] (!%p289_p2)   ;;  %vm363_vm0 = vsmask.f32 (!%p289_p2), 7424 }
   0x6   : > { %292 = sbr.rel (%p289_p2) target bundleno = 1456 (0x5b0), region = 56  ;;  %p325_p3 = scmp.lt.s32.totalorder (!%p289_p2), %s1742_s11, 15  ;;  %1931 = vmatprep.subr.bf16.mxu0 (!%p289_p2), %v2003_v0  ;;  %v2006_v19 = vld [vmem:[%s2560_s1 + $0x18] sm:$0xff] (!%p289_p2)   ;;  %vm456_vm1 = vcmask (!%p289_p2), 130048   ;;  %vm465_vm2 = vcmask (!%p289_p2), 261120   ;;  %vm474_vm3 = vcmask (!%p289_p2), 392192  }
   0x7   : > { %1932 = vmatpush3.bf16.msra.mxu0 (!%p289_p2), %v2003_v0  ;;  %s2069_s22 = smov (!%p289_p2), 32   ;;  %s2070_s25 = smov (!%p289_p2), 16   ;;  %vm522_vm4 = vcmask (!%p289_p2), 523264   ;;  %vm2073_vm5 = vmmov (!%p289_p2), 0   ;;  %vm674_vm6 = vcmask (!%p289_p2), 1042432   ;;  %vm638_vm7 = vcmask (!%p289_p2), 1046528  }
   0x8   : > { %1933 = vmatprep.subr.bf16.mxu0 (!%p289_p2), %v2004_v1  ;;  %s2071_s26 = smov (!%p289_p2), 48   ;;  %s2074_s27 = smov (!%p289_p2), 64   ;;  %vm650_vm8 = vcmask (!%p289_p2), 1043456   ;;  %vm662_vm9 = vsmask.f32 (!%p289_p2), 3328  ;;  %vm721_vm10 = vcmask (!%p289_p2), 785408  }
   0x9   : > { %s2075_s13 = smov (!%p289_p2), 96   ;;  %vm1667_vm11 = vcmask (!%p289_p2), 257024   ;;  %vm1661_vm12 = vcmask (!%p289_p2), 253952   ;;  %vm1662_vm13 = vsmask.f32 (!%p289_p2), 256 }
   0xa   : > { %vm1663_vm14 = vmand (!%p289_p2), %vm1661_vm12, %vm1662_vm13  ;;  %vm1668_vm15 = vsmask.f32 (!%p289_p2), 7938 }
   0xb   : > { %1934 = vmatpush3.bf16.msra.mxu0 (!%p289_p2), %v2004_v1 }
   0xc   : > { %1935 = vmatprep.subr.bf16.mxu0 (!%p289_p2), %v2005_v2 }
   0xd   : > { %s2570_s11 = smov (!%p325_p3, %s1742_s11), 15 }
   0xe   : > { %s1743_s16 = sshll.u32 %s2570_s11, 2 }
   0xf   : > { %s2152_s21 = scalar_lea.vmem %s2559_s0, %s1743_s16  ;;  %1936 = vmatpush3.bf16.msra.mxu0 %v2005_v2 }
  0x10   : > { %v338_v3 = vld [vmem:[%s2152_s21 + $0x4] sm:$0xf]  ;;  %v339_v4 = vld [vmem:[%s2152_s21 + $0x8] sm:$0xf]  ;;  %v337_v5 = vld [vmem:[%s2152_s21] sm:$0xf]  ;;  %1937 = vmatprep.subr.bf16.mxu0 %v2006_v19 }
  0x11   : > { %v1750_v6 = vcombine.low %v338_v3, %v339_v4  ;;  %v2157_v7 = vcombine.low %v337_v5, %v338_v3  ;;  %v342_v8 = vld [vmem:[%s2152_s21 + $0x14] sm:$0xf]  ;;  %v343_v9 = vld [vmem:[%s2152_s21 + $0x18] sm:$0xf]  ;;  %v340_v10 = vld [vmem:[%s2152_s21 + $0xc] sm:$0xf] }
  0x12   : > { %v2162_v11 = vcombine.low %v343_v9, %v343_v9  ;;  %v1752_v12 = vcombine.low %v342_v8, %v343_v9  ;;  %v341_v13 = vld [vmem:[%s2152_s21 + $0x10] sm:$0xf]  ;;  %v2165_v14 = vcombine.low %v339_v4, %v340_v10  ;;  %v2002_v28 = vld [vmem:[%s2152_s21 + $0x1c] ss:$0 sps:$4 sm:$0xff]  }
  0x13   : > { %409 = vrot.lane.b32.xlu1 %v1750_v6, %s2069_s22  ;;  %v420_v15 = vshll.u32 %v1750_v6, 16  ;;  %v2168_v16 = vcombine.low %v341_v13, %v342_v8  ;;  %v1751_v17 = vcombine.low %v340_v10, %v341_v13  ;;  %v365_v18 = vshrl.u32 %v2157_v7, 16  ;;  %1938 = vmatpush3.bf16.msra.mxu0 %v2006_v19 }
  0x14   : > { %413 = vrot.lane.b32.xlu0 %v1752_v12, %s2069_s22  ;;  %v367_v20 = vshll.u32 %v2157_v7, 16  ;;  %v372_v21 = vshll.u32 %v2165_v14, 16  ;;  %v388_v22 = vshll.u32 %v2162_v11, 16  ;;  %v392_v23 = vshrl.u32 %v2162_v11, 16 }
  0x15   : > { %v425_v24 = vshll.u32 %v1751_v17, 16  ;;  %v376_v25 = vshrl.u32 %v2165_v14, 16  ;;  %v380_v26 = vshll.u32 %v2168_v16, 16  ;;  %v429_v27 = vshrl.u32 %v1751_v17, 16 }
  0x16   : > { %v369_v29 = vrot.slane %v367_v20, 1  ;;  %v374_v30 = vrot.slane %v372_v21, 1  ;;  %v390_v31 = vrot.slane %v388_v22, 1  ;;  %v433_v32 = vshll.u32 %v1752_v12, 16  ;;  %v2009_v20 = vld [vmem:[%s2562_s3 + $0x40] sm:$0xff]   ;;  %v2011_v22 = vld [vmem:[%s2562_s3 + $0x48] sm:$0xff]  }
  0x17   : > { %411 = vrot.lane.b32.xlu1 %v1751_v17, %s2069_s22  ;;  %v382_v33 = vrot.slane %v380_v26, 1  ;;  %v427_v34 = vrot.slane %v425_v24, 1  ;;  %v418_v35 = vshrl.u32 %v1750_v6, 16  ;;  %v422_v36 = vrot.slane %v420_v15, 1  ;;  %v2010_v21 = vld [vmem:[%s2562_s3] sm:$0xff]   ;;  %1835 = vmatprep.subr.bf16.mxu1 %v2009_v20  ;;  %v2013_v24 = vld [vmem:[%s2562_s3 + $0x50] sm:$0xff]  }
  0x18   : > { %v370_v37 = vor.u32 %v369_v29, %v365_v18  ;;  %v394_v38 = vor.u32 %v392_v23, %v390_v31  ;;  %v378_v39 = vor.u32 %v376_v25, %v374_v30  ;;  %v435_v40 = vrot.slane %v433_v32, 1  ;;  %1836 = vmatpush3.bf16.msra.mxu1 %v2010_v21  ;;  %v2012_v23 = vld [vmem:[%s2562_s3 + $0x8] sm:$0xff]   ;;  %v2014_v25 = vld [vmem:[%s2562_s3 + $0x10] sm:$0xff]   ;;  %v2015_v26 = vld [vmem:[%s2562_s3 + $0x58] sm:$0xff]  }
  0x19   : > { %v431_v41 = vor.u32 %v429_v27, %v427_v34  ;;  %v423_v43 = vor.u32 %v422_v36, %v418_v35  ;;  %v441_v44 = vshll.u32 %v2002_v28, 16  ;;  %v384_v47 = vshrl.u32 %v2168_v16, 16  ;;  %1837 = vmatprep.subr.bf16.mxu1 %v2011_v22  ;;  %v2016_v27 = vld [vmem:[%s2562_s3 + $0x18] sm:$0xff]   ;;  %v1754_v29 = vld [vmem:[%s2561_s2] ss:$0 sm:$0xff]  ;;  %v2019_v32 = vld [vmem:[%s2562_s3 + $0x68] sm:$0xff]  }
  0x1a   : > { %v375_v42 = vsel %vm363_vm0, %v370_v37, %v374_v30  ;;  %v383_v45 = vsel %vm363_vm0, %v378_v39, %v382_v33  ;;  %v445_v48 = vshrl.u32 %v2002_v28, 16  ;;  %v437_v50 = vshrl.u32 %v1752_v12, 16  ;;  %v2020_v39 = vld [vmem:[%s2562_s3 + $0x28] sm:$0xff]  }
  0x1b   : > { %395 = vrot.lane.b32.xlu0 %v375_v42, %s2070_s25  ;;  %401 = vrot.lane.b32.xlu1 %v394_v38, %s2070_s25  ;;  %v436_v46 = vsel %vm363_vm0, %v431_v41, %v435_v40  ;;  %v443_v49 = vrot.slane %v441_v44, 1  ;;  %v428_v51 = vsel %vm363_vm0, %v423_v43, %v427_v34  ;;  %v386_v52 = vor.u32 %v384_v47, %v382_v33  ;;  %v2021_v41 = vld [vmem:[%s2562_s3 + $0x70] sm:$0xff]  }
  0x1c   : > { %v439_v55 = vor.u32 %v437_v50, %v435_v40  ;;  %v2072_v19 = vmov 0.0   ;;  %1838 = vmatpush3.bf16.msra.mxu1 %v2012_v23 }
  0x1d   : > { %v447_v53 = vor.u32 %v445_v48, %v443_v49  ;;  %v391_v54 = vsel %vm363_vm0, %v386_v52, %v390_v31  ;;  %1947 = vmatprep.subr.bf16.mxu0 %v2072_v19  ;;  %1839 = vmatprep.subr.bf16.mxu1 %v2013_v24  ;;  %v2018_v31 = vld [vmem:[%s2562_s3 + $0x20] sm:$0xff]  }
  0x1e   : > { %v444_v56 = vsel %vm363_vm0, %v439_v55, %v443_v49  ;;  %v2022_v49 = vld [vmem:[%s2562_s3 + $0x30] sm:$0xff]  }
  0x1f   : > { %397 = vrot.lane.b32.xlu0 %v383_v45, %s2070_s25  ;;  %450 = vrot.lane.b32.xlu1 %v436_v46, %s2071_s26 }
  0x20   : > { %1840 = vmatpush3.bf16.msra.mxu1 %v2014_v25 }
  0x21   : > { %1841 = vmatprep.subr.bf16.mxu1 %v2015_v26 }
  0x23   : > { %448 = vrot.lane.b32.xlu0 %v428_v51, %s2071_s26  ;;  %415 = vrot.lane.b32.xlu1 %v2002_v28, %s2069_s22  ;;  %v2017_v28 = vld [vmem:[%s2562_s3 + $0x60] sm:$0xff]  }
  0x24   : > { %1842 = vmatpush3.bf16.msra.mxu1 %v2016_v27 }
  0x25   : > { %1843 = vmatprep.subr.bf16.mxu1 %v2017_v28 }
  0x27   : > { %399 = vrot.lane.b32.xlu0 %v391_v54, %s2070_s25  ;;  %454 = vrot.lane.b32.xlu1 %v447_v53, %s2071_s26  ;;  %v2023_v53 = vld [vmem:[%s2562_s3 + $0x78] sm:$0xff]  }
  0x28   : > { %1844 = vmatpush3.bf16.msra.mxu1 %v2018_v31 }
  0x29   : > { %1845 = vmatprep.subr.bf16.mxu1 %v2019_v32 }
  0x2b   : > { %452 = vrot.lane.b32.xlu0 %v444_v56, %s2071_s26 }
  0x2c   : > { %1846 = vmatpush3.bf16.msra.mxu1 %v2020_v39 }
  0x2d   : > { %1847 = vmatprep.subr.bf16.mxu1 %v2021_v41 }
  0x30   : > { %1848 = vmatpush3.bf16.msra.mxu1 %v2022_v49 }
  0x31   : > { %1849 = vmatprep.subr.bf16.mxu1 %v2023_v53 }
  0x85   : > { %v410_v57 = vpop.permute.xlu1 %409 }
  0x86   : > { %v414_v58 = vpop.permute.xlu0 %413 }
  0x89   : > { %v412_v59 = vpop.permute.xlu1 %411 }
  0x8d   : > { %v396_v60 = vpop.permute.xlu0 %395  ;;  %v402_v61 = vpop.permute.xlu1 %401 }
  0x8e   : > { %v458_v0 = vsel %vm456_vm1, %v2157_v7, %v396_v60  ;;  %v464_v12 = vsel %vm456_vm1, %v2162_v11, %v402_v61  ;;  %v2008_v11 = vld [vmem:[%s2562_s3 + $0x88] sm:$0xff]  }
  0x8f   : > { %v467_v4 = vsel %vm465_vm2, %v458_v0, %v410_v57  ;;  %v2024_v0 = vld [vmem:[%s2562_s3 + $0x38] sm:$0xff]  }
  0x90   : > { %1850 = vmatpush3.bf16.msra.mxu1 %v2024_v0 }
  0x91   : > { %v398_v62 = vpop.permute.xlu0 %397  ;;  %v451_v63 = vpop.permute.xlu1 %450 }
  0x92   : > { %v460_v1 = vsel %vm456_vm1, %v2165_v14, %v398_v62 }
  0x93   : > { %v469_v2 = vsel %vm465_vm2, %v460_v1, %v412_v59 }
  0x94   : > { %v478_v8 = vsel %vm474_vm3, %v469_v2, %v451_v63 }
  0x95   : > { %v449_v3 = vpop.permute.xlu0 %448  ;;  %v416_v5 = vpop.permute.xlu1 %415 }
  0x96   : > { %v476_v6 = vsel %vm474_vm3, %v467_v4, %v449_v3  ;;  %v473_v15 = vsel %vm465_vm2, %v464_v12, %v416_v5 }
  0x97   : > { %1939 = vmatprep.mubr.msk.bf16.mxu0 %vm522_vm4, %v476_v6 }
  0x98   : > { %1940 = vmatmul.mubr.msk.bf16.vlgmr.msra.gmra.mrb[0].mxu0 %vm522_vm4, %v478_v8 }
  0x99   : > { %v400_v7 = vpop.permute.xlu0 %399  ;;  %v455_v10 = vpop.permute.xlu1 %454 }
  0x9a   : > { %v462_v9 = vsel %vm456_vm1, %v2168_v16, %v400_v7  ;;  %v482_v18 = vsel %vm474_vm3, %v473_v15, %v455_v10  ;;  %v2007_v16 = vld [vmem:[%s2562_s3 + $0x80] sm:$0xff]  }
  0x9b   : > { %v471_v13 = vsel %vm465_vm2, %v462_v9, %v414_v58  ;;  %1948 = vmatpush3.bf16.msra.mxu0 %v2007_v16 }
  0x9c   : > { %1949 = vmatprep.subr.bf16.mxu0 %v2072_v19 }
  0x9d   : > { %v453_v14 = vpop.permute.xlu0 %452 }
  0x9e   : > { %v480_v17 = vsel %vm474_vm3, %v471_v13, %v453_v14 }
  0x9f   : > { %1943 = vmatprep.mubr.msk.bf16.mxu0 %vm522_vm4, %v480_v17  ;;  %1950 = vmatpush3.bf16.msra.mxu0 %v2008_v11 }
  0xa0   : > { %1944 = vmatmul.mubr.msk.bf16.gmra.mrb[4].mxu0 %vm522_vm4, %v482_v18 }
  0xa1   : > { %1951 = vmatprep.mubr.msk.bf16.mxu0 %vm2073_vm5, %v2072_v19 }
 0x16b   : > { %v1941_v30 = vpop.f32.mrb[0].mxu0 }
 0x16c   : > { %v574_v33 = vadd.f32 %v1941_v30, %v1754_v29  ;;  %v565_v34 = vpop.f32.mrb[1].mxu0 }
 0x16d   : > { %v566_v35 = vadd.f32 %v1754_v29, %v565_v34  ;;  %v1942_v36 = vpop.f32.mrb[2].mxu0 }
 0x16e   : > { %v577_v37 = vadd.f32 %v1942_v36, %v1754_v29  ;;  %v568_v38 = vpop.f32.mrb[3].mxu0  ;;  %v597_v42 = vmax.f32 %v574_v33, 0.0 }
 0x16f   : > { %v569_v40 = vadd.f32 %v1754_v29, %v568_v38  ;;  %v595_v44 = vmax.f32 %v566_v35, 0.0 }
 0x170   : > { %v598_v43 = vmax.f32 %v577_v37, 0.0 }
 0x171   : > { %v596_v45 = vmax.f32 %v569_v40, 0.0 }
 0x172   : > { %v2263_v46 = vpack.c.bf16 %v598_v43, %v597_v42 }
 0x173   : > { %v2265_v47 = vpack.c.bf16 %v596_v45, %v595_v44  ;;  %v1945_v48 = vpop.f32.mrb[4].mxu0 }
 0x174   : > { %687 = vrot.lane.b32.xlu0 %v2263_v46, %s2074_s27  ;;  %v581_v50 = vpop.f32.mrb[5].mxu0  ;;  %v676_v51 = vrot.slane %v2263_v46, 5  ;;  %v640_v52 = vrot.slane %v2263_v46, 1  ;;  %v652_v58 = vrot.slane %v2263_v46, 4  ;;  %v614_v63 = vshll.u32 %v2263_v46, 16 }
 0x175   : > { %v582_v54 = vadd.f32 %v1754_v29, %v581_v50  ;;  %v1946_v55 = vpop.f32.mrb[6].mxu0  ;;  %v675_v56 = vrot.slane %v2265_v47, 5  ;;  %v639_v57 = vrot.slane %v2265_v47, 1  ;;  %v651_v60 = vrot.slane %v2265_v47, 4 }
 0x176   : > { %v584_v59 = vpop.f32.mrb[7].mxu0  ;;  %v607_v61 = vshrl.u32 %v2265_v47, 16  ;;  %v609_v62 = vshll.u32 %v2265_v47, 16  ;;  %v590_v4 = vadd.f32 %v1945_v48, %v1754_v29  ;;  %v618_v7 = vshrl.u32 %v2263_v46, 16 }
 0x177   : > { %v585_v1 = vadd.f32 %v1754_v29, %v584_v59  ;;  %v677_v2 = vsel %vm674_vm6, %v675_v56, %v676_v51  ;;  %v641_v3 = vsel %vm638_vm7, %v639_v57, %v640_v52  ;;  %v599_v6 = vmax.f32 %v582_v54, 0.0 }
 0x178   : > { %680 = vrot.lane.b32.xlu0 %v677_v2, %s2069_s22  ;;  %644 = vrot.lane.b32.xlu1 %v641_v3, %s2074_s27  ;;  %v611_v5 = vrot.slane %v609_v62, 1  ;;  %v653_v9 = vsel %vm650_vm8, %v651_v60, %v652_v58  ;;  %v663_v10 = vrot.slane %v607_v61, 4  ;;  %v667_v12 = vrot.slane %v614_v63, 5 }
 0x179   : > { %v600_v8 = vmax.f32 %v585_v1, 0.0  ;;  %v666_v15 = vrot.slane %v618_v7, 4  ;;  %v664_v17 = vrot.slane %v609_v62, 5  ;;  %v601_v18 = vmax.f32 %v590_v4, 0.0 }
 0x17a   : > { %v612_v14 = vor.u32 %v611_v5, %v607_v61  ;;  %v616_v16 = vrot.slane %v614_v63, 1 }
 0x17b   : > { %v2293_v13 = vpack.c.bf16 %v600_v8, %v599_v6  ;;  %v665_v23 = vor.u32 %v664_v17, %v663_v10  ;;  %v668_v24 = vor.u32 %v667_v12, %v666_v15  ;;  %v605_v32 = vpack.c.bf16 %v601_v18, %v601_v18 }
 0x17c   : > { %656 = vrot.lane.b32.xlu1 %v653_v9, %s2075_s13  ;;  %v617_v25 = vsel %vm363_vm0, %v612_v14, %v616_v16  ;;  %v620_v33 = vor.u32 %v618_v7, %v616_v16 }
 0x17d   : > { %689 = vrot.lane.b32.xlu0 %v2293_v13, %s2074_s27  ;;  %v642_v11 = vrot.slane %v2293_v13, 1  ;;  %v678_v20 = vrot.slane %v2293_v13, 5  ;;  %v622_v21 = vshll.u32 %v2293_v13, 16  ;;  %v626_v22 = vshrl.u32 %v2293_v13, 16 }
 0x17e   : > { %v669_v29 = vsel %vm662_vm9, %v665_v23, %v668_v24  ;;  %v654_v35 = vrot.slane %v2293_v13, 4  ;;  %v707_v38 = vrot.slane %v605_v32, 1  ;;  %v694_v39 = vshll.u32 %v605_v32, 16 }
 0x17f   : > { %v643_v26 = vsel %vm638_vm7, %v640_v52, %v642_v11  ;;  %v679_v27 = vsel %vm674_vm6, %v676_v51, %v678_v20  ;;  %v624_v28 = vrot.slane %v622_v21, 1  ;;  %v670_v30 = vrot.slane %v626_v22, 4 }
 0x180   : > { %629 = vrot.lane.b32.xlu1 %v617_v25, %s2069_s22  ;;  %1952 = vmatmul.mubr.msk.bf16.vlgmr.msra.gmra.mrb[8].mxu0 %vm465_vm2, %v643_v26  ;;  %v671_v31 = vrot.slane %v622_v21, 5  ;;  %v655_v40 = vsel %vm650_vm8, %v652_v58, %v654_v35  ;;  %v708_v41 = vsel %vm638_vm7, %v642_v11, %v707_v38  ;;  %v696_v43 = vrot.slane %v694_v39, 1  ;;  %v2032_v39 = vld [vmem:[%s2564_s5 + $0x10] sm:$0xff]  }
 0x181   : > { %682 = vrot.lane.b32.xlu0 %v679_v27, %s2069_s22  ;;  %1955 = vmatprep.mubr.msk.bf16.mxu0 %vm2073_vm5, %v2072_v19  ;;  %v625_v36 = vsel %vm363_vm0, %v620_v33, %v624_v28  ;;  %v628_v42 = vor.u32 %v626_v22, %v624_v28  ;;  %v698_v45 = vshrl.u32 %v605_v32, 16  ;;  %v2026_v33 = vld [vmem:[%s2564_s5 + $0x88] sm:$0xff]  }
 0x182   : > { %v672_v34 = vor.u32 %v671_v31, %v670_v30 }
 0x183   : > { %v697_v44 = vsel %vm363_vm0, %v628_v42, %v696_v43  ;;  %v700_v48 = vor.u32 %v698_v45, %v696_v43 }
 0x184   : > { %646 = vrot.lane.b32.xlu1 %v643_v26, %s2074_s27  ;;  %v673_v37 = vsel %vm662_vm9, %v668_v24, %v672_v34 }
 0x185   : > { %701 = vrot.lane.b32.xlu0 %v625_v36, %s2075_s13 }
 0x188   : > { %658 = vrot.lane.b32.xlu1 %v655_v40, %s2075_s13  ;;  %1956 = vmatmul.mubr.msk.bf16.gmra.mrb[12].mxu0 %vm465_vm2, %v708_v41  ;;  %v2033_v40 = vld [vmem:[%s2564_s5 + $0x58] sm:$0xff]  }
 0x189   : > { %684 = vrot.lane.b32.xlu0 %v678_v20, %s2069_s22  ;;  %1959 = vmatprep.mubr.msk.bf16.mxu0 %vm2073_vm5, %v2072_v19  ;;  %v2034_v41 = vld [vmem:[%s2564_s5 + $0x18] sm:$0xff]  }
 0x18c   : > { %631 = vrot.lane.b32.xlu1 %v625_v36, %s2069_s22  ;;  %v2029_v36 = vld [vmem:[%s2564_s5 + $0x48] sm:$0xff]  }
 0x18d   : > { %703 = vrot.lane.b32.xlu0 %v697_v44, %s2075_s13  ;;  %v1763_v44 = vld [vmem:[%s2563_s4] ss:$0 sm:$0xff] }
 0x190   : > { %1960 = vmatmul.mubr.msk.bf16.gmra.mrb[16].mxu0 %vm465_vm2, %v707_v38  ;;  %633 = vrot.lane.b32.xlu1 %v628_v42, %s2069_s22  ;;  %v2031_v38 = vld [vmem:[%s2564_s5 + $0x50] sm:$0xff]   ;;  %v2035_v42 = vld [vmem:[%s2564_s5 + $0x60] sm:$0xff]  }
 0x191   : > { %691 = vrot.lane.b32.xlu0 %v605_v32, %s2074_s27  ;;  %v2025_v32 = vld [vmem:[%s2564_s5 + $0x80] sm:$0xff]  }
 0x192   : > { %1963 = vmatprep.subr.bf16.mxu1 %v2025_v32 }
 0x194   : > { %648 = vrot.lane.b32.xlu1 %v642_v11, %s2074_s27 }
 0x195   : > { %705 = vrot.lane.b32.xlu0 %v700_v48, %s2075_s13 }
 0x198   : > { %660 = vrot.lane.b32.xlu1 %v654_v35, %s2075_s13  ;;  %v2028_v35 = vld [vmem:[%s2564_s5] sm:$0xff]  }
 0x1e6   : > { %v688_v49 = vpop.permute.xlu0 %687 }
 0x1ea   : > { %v645_v50 = vpop.permute.xlu1 %644  ;;  %v681_v51 = vpop.permute.xlu0 %680 }
 0x1eb   : > { %v733_v57 = vsel %vm465_vm2, %v669_v29, %v681_v51 }
 0x1ec   : > { %v741_v61 = vsel %vm522_vm4, %v733_v57, %v688_v49  ;;  %v2036_v57 = vld [vmem:[%s2564_s5 + $0x20] sm:$0xff]  }
 0x1ee   : > { %v657_v52 = vpop.permute.xlu1 %656 }
 0x1ef   : > { %v690_v53 = vpop.permute.xlu0 %689 }
 0x1f2   : > { %v630_v54 = vpop.permute.xlu1 %629 }
 0x1f3   : > { %v710_v55 = vsel %vm465_vm2, %v2265_v47, %v630_v54  ;;  %v683_v56 = vpop.permute.xlu0 %682 }
 0x1f4   : > { %v716_v59 = vsel %vm522_vm4, %v710_v55, %v645_v50  ;;  %v736_v47 = vsel %vm465_vm2, %v673_v37, %v683_v56  ;;  %v2030_v37 = vld [vmem:[%s2564_s5 + $0x8] sm:$0xff]  }
 0x1f5   : > { %v723_v63 = vsel %vm721_vm10, %v716_v59, %v657_v52  ;;  %v743_v5 = vsel %vm522_vm4, %v736_v47, %v690_v53 }
 0x1f6   : > { %v647_v58 = vpop.permute.xlu1 %646 }
 0x1f7   : > { %v702_v60 = vpop.permute.xlu0 %701 }
 0x1f8   : > { %v747_v62 = vsel %vm721_vm10, %v741_v61, %v702_v60 }
 0x1f9   : > { %947 = vmatprep.mubr.bf16.mxu1 %v747_v62 }
 0x1fa   : > { %v659_v0 = vpop.permute.xlu1 %658  ;;  %948 = vmatmul.mubr.bf16.vlgmr.msra.gmra.mrb[0].mxu1 %v723_v63 }
 0x1fb   : > { %v685_v1 = vpop.permute.xlu0 %684  ;;  %1964 = vmatpush3.bf16.msra.mxu1 %v2025_v32 }
 0x1fc   : > { %v739_v12 = vsel %vm465_vm2, %v672_v34, %v685_v1  ;;  %1965 = vmatprep.subr.bf16.mxu1 %v2026_v33  ;;  %v2027_v34 = vld [vmem:[%s2564_s5 + $0x40] sm:$0xff]  }
 0x1fd   : > { %1874 = vmatprep.subr.bf16.mxu0 %v2027_v34 }
 0x1fe   : > { %v632_v2 = vpop.permute.xlu1 %631  ;;  %1875 = vmatpush3.bf16.msra.mxu0 %v2028_v35 }
 0x1ff   : > { %v712_v3 = vsel %vm465_vm2, %v2263_v46, %v632_v2  ;;  %v704_v4 = vpop.permute.xlu0 %703  ;;  %1966 = vmatpush3.bf16.msra.mxu1 %v2026_v33  ;;  %1876 = vmatprep.subr.bf16.mxu0 %v2029_v36 }
 0x200   : > { %v750_v6 = vsel %vm721_vm10, %v743_v5, %v704_v4  ;;  %v718_v8 = vsel %vm522_vm4, %v712_v3, %v647_v58  ;;  %v2038_v3 = vld [vmem:[%s2564_s5 + $0x28] sm:$0xff]  }
 0x201   : > { %955 = vmatprep.mubr.bf16.mxu1 %v750_v6  ;;  %v726_v7 = vsel %vm721_vm10, %v718_v8, %v659_v0  ;;  %v2037_v0 = vld [vmem:[%s2564_s5 + $0x68] sm:$0xff]  }
 0x202   : > { %v634_v9 = vpop.permute.xlu1 %633  ;;  %956 = vmatmul.mubr.bf16.gmra.mrb[4].mxu1 %v726_v7  ;;  %1877 = vmatpush3.bf16.msra.mxu0 %v2030_v37  ;;  %v2039_v7 = vld [vmem:[%s2564_s5 + $0x70] sm:$0xff]  }
 0x203   : > { %v692_v10 = vpop.permute.xlu0 %691  ;;  %v714_v18 = vsel %vm465_vm2, %v2293_v13, %v634_v9  ;;  %1878 = vmatprep.subr.bf16.mxu0 %v2031_v38 }
 0x204   : > { %v745_v15 = vsel %vm522_vm4, %v739_v12, %v692_v10 }
 0x206   : > { %v649_v14 = vpop.permute.xlu1 %648  ;;  %1879 = vmatpush3.bf16.msra.mxu0 %v2032_v39 }
 0x207   : > { %v706_v17 = vpop.permute.xlu0 %705  ;;  %v720_v16 = vsel %vm522_vm4, %v714_v18, %v649_v14  ;;  %1880 = vmatprep.subr.bf16.mxu0 %v2033_v40  ;;  %v2040_v14 = vld [vmem:[%s2564_s5 + $0x30] sm:$0xff]  }
 0x208   : > { %v753_v46 = vsel %vm721_vm10, %v745_v15, %v706_v17 }
 0x209   : > { %963 = vmatprep.mubr.bf16.mxu1 %v753_v46 }
 0x20a   : > { %v661_v11 = vpop.permute.xlu1 %660  ;;  %1881 = vmatpush3.bf16.msra.mxu0 %v2034_v41 }
 0x20b   : > { %v729_v20 = vsel %vm721_vm10, %v720_v16, %v661_v11  ;;  %1882 = vmatprep.subr.bf16.mxu0 %v2035_v42 }
 0x20c   : > { %964 = vmatmul.mubr.bf16.gmra.mrb[8].mxu1 %v729_v20 }
 0x20e   : > { %1883 = vmatpush3.bf16.msra.mxu0 %v2036_v57 }
 0x20f   : > { %1884 = vmatprep.subr.bf16.mxu0 %v2037_v0 }
 0x212   : > { %1885 = vmatpush3.bf16.msra.mxu0 %v2038_v3 }
 0x213   : > { %1886 = vmatprep.subr.bf16.mxu0 %v2039_v7 }
 0x216   : > { %1887 = vmatpush3.bf16.msra.mxu0 %v2040_v14 }
 0x253   : > { %v1005_v21 = vpop.f32.mrb[8].mxu0 }
 0x254   : > { %v1953_v22 = vpop.f32.mrb[9].mxu0 }
 0x255   : > { %v1008_v23 = vpop.f32.mrb[10].mxu0 }
 0x256   : > { %v1954_v24 = vpop.f32.mrb[11].mxu0 }
 0x257   : > { %v2042_v24 = vld [vmem:[%s2564_s5 + $0x38] sm:$0xff]  }
 0x25b   : > { %v1013_v25 = vpop.f32.mrb[12].mxu0 }
 0x25c   : > { %v1957_v26 = vpop.f32.mrb[13].mxu0 }
 0x25d   : > { %v1016_v27 = vpop.f32.mrb[14].mxu0 }
 0x25e   : > { %v1958_v28 = vpop.f32.mrb[15].mxu0 }
 0x263   : > { %v2353_v29 = vpop.f32.mrb[16].mxu0 }
 0x264   : > { %v1961_v30 = vpop.f32.mrb[17].mxu0 }
 0x265   : > { %v1024_v31 = vpop.f32.mrb[18].mxu0 }
 0x266   : > { %v1962_v13 = vpop.f32.mrb[19].mxu0 }
 0x2cd   : > { %v1851_v43 = vpop.f32.mrb[0].mxu1 }
 0x2ce   : > { %v1852_v45 = vpop.f32.mrb[1].mxu1 }
 0x2cf   : > { %v1853_v48 = vadd.f32 %v1852_v45, %v1851_v43  ;;  %v1854_v49 = vpop.f32.mrb[2].mxu1 }
 0x2d0   : > { %v1855_v50 = vpop.f32.mrb[3].mxu1 }
 0x2d1   : > { %v950_v51 = vadd.f32 %v1853_v48, %v1763_v44  ;;  %v1856_v52 = vadd.f32 %v1855_v50, %v1854_v49 }
 0x2d3   : > { %v1006_v53 = vadd.f32 %v1005_v21, %v950_v51  ;;  %v953_v54 = vadd.f32 %v1856_v52, %v1763_v44 }
 0x2d5   : > { %v1009_v55 = vadd.f32 %v1008_v23, %v953_v54  ;;  %v1857_v56 = vpop.f32.mrb[4].mxu1  ;;  %v1027_v59 = vmax.f32 %v1006_v53, 0.0  ;;  %v2041_v23 = vld [vmem:[%s2564_s5 + $0x78] sm:$0xff]  }
 0x2d6   : > { %v1858_v58 = vpop.f32.mrb[5].mxu1  ;;  %1888 = vmatprep.subr.bf16.mxu0 %v2041_v23  ;;  %v2045_v23 = vld [vmem:[%s2566_s7 + $0x40] sm:$0xff]  }
 0x2d7   : > { %v1028_v60 = vmax.f32 %v1009_v55, 0.0  ;;  %v1859_v61 = vadd.f32 %v1858_v58, %v1857_v56  ;;  %v1860_v62 = vpop.f32.mrb[6].mxu1  ;;  %1889 = vmatpush3.bf16.msra.mxu0 %v2042_v24  ;;  %v2046_v24 = vld [vmem:[%s2566_s7] sm:$0xff]   ;;  %1906 = vmatprep.subr.bf16.mxu1 %v2045_v23 }
 0x2d8   : > { %v1861_v63 = vpop.f32.mrb[7].mxu1  ;;  %1971 = vmatprep.subr.bf16.mxu0 %v2072_v19  ;;  %v1467_v23 = vld [vmem:[%s2567_s8] sm:$0x1] }
 0x2d9   : > { %v2397_v1 = vpack.c.bf16 %v1028_v60, %v1027_v59  ;;  %v958_v47 = vadd.f32 %v1859_v61, %v1763_v44  ;;  %v1862_v2 = vadd.f32 %v1861_v63, %v1860_v62 }
 0x2db   : > { %v1014_v4 = vadd.f32 %v1013_v25, %v958_v47  ;;  %v961_v5 = vadd.f32 %v1862_v2, %v1763_v44  ;;  %v1036_v6 = vshrl.u32 %v2397_v1, 16  ;;  %v1038_v8 = vshll.u32 %v2397_v1, 16 }
 0x2dc   : > { %v1056_v26 = vrot.slane %v2397_v1, 1  ;;  %v1063_v37 = vrot.slane %v2397_v1, 4 }
 0x2dd   : > { %v1017_v9 = vadd.f32 %v1016_v27, %v961_v5  ;;  %v1070_v10 = vrot.slane %v1036_v6, 4  ;;  %v1071_v12 = vrot.slane %v1038_v8, 5  ;;  %v1029_v15 = vmax.f32 %v1014_v4, 0.0 }
 0x2de   : > { %v1040_v38 = vrot.slane %v1038_v8, 1 }
 0x2df   : > { %v1030_v17 = vmax.f32 %v1017_v9, 0.0  ;;  %v1863_v46 = vpop.f32.mrb[8].mxu1  ;;  %v1072_v16 = vor.u32 %v1071_v12, %v1070_v10 }
 0x2e0   : > { %v1864_v18 = vpop.f32.mrb[9].mxu1  ;;  %v1041_v45 = vor.u32 %v1040_v38, %v1036_v6 }
 0x2e1   : > { %v2410_v11 = vpack.c.bf16 %v1030_v17, %v1029_v15  ;;  %v1865_v20 = vadd.f32 %v1864_v18, %v1863_v46  ;;  %v1866_v21 = vpop.f32.mrb[10].mxu1 }
 0x2e2   : > { %v1867_v22 = vpop.f32.mrb[11].mxu1 }
 0x2e3   : > { %v966_v25 = vadd.f32 %v1865_v20, %v1763_v44  ;;  %1085 = vrot.lane.b32.xlu0 %v2410_v11, %s2074_s27  ;;  %v1057_v27 = vrot.slane %v2410_v11, 1  ;;  %v1043_v28 = vshll.u32 %v2410_v11, 16  ;;  %v1047_v30 = vshrl.u32 %v2410_v11, 16  ;;  %v2044_v22 = vld [vmem:[%s2566_s7 + $0x88] sm:$0xff]  }
 0x2e4   : > { %v1078_v32 = vrot.slane %v2410_v11, 5  ;;  %v1064_v33 = vrot.slane %v2410_v11, 4 }
 0x2e5   : > { %v1022_v31 = vadd.f32 %v2353_v29, %v966_v25  ;;  %v1058_v13 = vsel %vm638_vm7, %v1056_v26, %v1057_v27  ;;  %v1073_v34 = vrot.slane %v1047_v30, 4  ;;  %v1074_v35 = vrot.slane %v1043_v28, 5  ;;  %v2047_v25 = vld [vmem:[%s2566_s7 + $0x48] sm:$0xff]  }
 0x2e6   : > { %1059 = vrot.lane.b32.xlu1 %v1058_v13, %s2074_s27  ;;  %v1077_v29 = vrot.slane %v2397_v1, 5  ;;  %v1065_v41 = vsel %vm650_vm8, %v1063_v37, %v1064_v33  ;;  %v1045_v42 = vrot.slane %v1043_v28, 1  ;;  %v2048_v26 = vld [vmem:[%s2566_s7 + $0x8] sm:$0xff]   ;;  %v2051_v28 = vld [vmem:[%s2566_s7 + $0x58] sm:$0xff]   ;;  %v2054_v13 = vld [vmem:[%s2566_s7 + $0x20] sm:$0xff]  }
 0x2e7   : > { %v1031_v36 = vmax.f32 %v1022_v31, 0.0  ;;  %1082 = vrot.lane.b32.xlu0 %v1078_v32, %s2069_s22  ;;  %v1075_v39 = vor.u32 %v1074_v35, %v1073_v34  ;;  %v2053_v31 = vld [vmem:[%s2566_s7 + $0x60] sm:$0xff]  }
 0x2e8   : > { %v1079_v43 = vsel %vm674_vm6, %v1077_v29, %v1078_v32  ;;  %v1046_v50 = vsel %vm363_vm0, %v1041_v45, %v1045_v42  ;;  %v1049_v52 = vor.u32 %v1047_v30, %v1045_v42  ;;  %v2052_v30 = vld [vmem:[%s2566_s7 + $0x18] sm:$0xff]   ;;  %v2055_v32 = vld [vmem:[%s2566_s7 + $0x68] sm:$0xff]   ;;  %v1785_v34 = vld [vmem:[%s2565_s6] ss:$0 sm:$0xff] }
 0x2e9   : > { %v1034_v40 = vpack.c.bf16 %v1031_v36, %v1031_v36  ;;  %v1076_v44 = vsel %vm662_vm9, %v1072_v16, %v1075_v39  ;;  %v2056_v29 = vld [vmem:[%s2566_s7 + $0x28] sm:$0xff]  }
 0x2ea   : > { %1066 = vrot.lane.b32.xlu1 %v1065_v41, %s2075_s13 }
 0x2eb   : > { %1080 = vrot.lane.b32.xlu0 %v1079_v43, %s2069_s22  ;;  %v1101_v48 = vrot.slane %v1034_v40, 1  ;;  %v1090_v49 = vshll.u32 %v1034_v40, 16  ;;  %v1094_v55 = vshrl.u32 %v1034_v40, 16 }
 0x2ed   : > { %v1102_v51 = vsel %vm638_vm7, %v1057_v27, %v1101_v48  ;;  %v1092_v53 = vrot.slane %v1090_v49, 1 }
 0x2ee   : > { %1050 = vrot.lane.b32.xlu1 %v1046_v50, %s2069_s22  ;;  %1967 = vmatprep.mubr.msk.bf16.mxu1 %vm465_vm2, %v1102_v51 }
 0x2ef   : > { %1968 = vmatmul.mubr.msk.bf16.vlgmr.msra.gmra.mrb[12].mxu1 %vm465_vm2, %v1101_v48  ;;  %v1093_v54 = vsel %vm363_vm0, %v1049_v52, %v1092_v53  ;;  %v1096_v56 = vor.u32 %v1094_v55, %v1092_v53  ;;  %v2059_v48 = vld [vmem:[%s2566_s7 + $0x78] sm:$0xff]   ;;  %vm1669_vm0 = vmand %vm1667_vm11, %vm1668_vm15 }
 0x2f0   : > { %1097 = vrot.lane.b32.xlu0 %v1093_v54, %s2075_s13  ;;  %1907 = vmatpush3.bf16.msra.mxu1 %v2046_v24  ;;  %v2060_v55 = vld [vmem:[%s2566_s7 + $0x38] sm:$0xff]  }
 0x2f1   : > { %1908 = vmatprep.subr.bf16.mxu1 %v2047_v25 }
 0x2f2   : > { %1052 = vrot.lane.b32.xlu1 %v1049_v52, %s2069_s22 }
 0x2f4   : > { %1087 = vrot.lane.b32.xlu0 %v1034_v40, %s2074_s27  ;;  %1909 = vmatpush3.bf16.msra.mxu1 %v2048_v26 }
 0x2f6   : > { %1061 = vrot.lane.b32.xlu1 %v1057_v27, %s2074_s27  ;;  %v2050_v27 = vld [vmem:[%s2566_s7 + $0x10] sm:$0xff]  }
 0x2f8   : > { %1099 = vrot.lane.b32.xlu0 %v1096_v56, %s2075_s13 }
 0x2fa   : > { %1068 = vrot.lane.b32.xlu1 %v1064_v33, %s2075_s13 }
 0x355   : > { %v1086_v57 = vpop.permute.xlu0 %1085 }
 0x358   : > { %v1060_v58 = vpop.permute.xlu1 %1059 }
 0x359   : > { %v1083_v59 = vpop.permute.xlu0 %1082 }
 0x35a   : > { %v1122_v9 = vsel %vm465_vm2, %v1075_v39, %v1083_v59  ;;  %v2057_v39 = vld [vmem:[%s2566_s7 + $0x70] sm:$0xff]  }
 0x35c   : > { %v1067_v60 = vpop.permute.xlu1 %1066 }
 0x35d   : > { %v1081_v61 = vpop.permute.xlu0 %1080 }
 0x35e   : > { %v1119_v62 = vsel %vm465_vm2, %v1076_v44, %v1081_v61  ;;  %v2058_v44 = vld [vmem:[%s2566_s7 + $0x30] sm:$0xff]  }
 0x35f   : > { %v1124_v3 = vsel %vm522_vm4, %v1119_v62, %v1086_v57 }
 0x360   : > { %v1051_v63 = vpop.permute.xlu1 %1050 }
 0x361   : > { %v1104_v0 = vsel %vm465_vm2, %v2397_v1, %v1051_v63 }
 0x362   : > { %v1108_v47 = vsel %vm522_vm4, %v1104_v0, %v1060_v58  ;;  %v1098_v2 = vpop.permute.xlu0 %1097 }
 0x363   : > { %v1128_v4 = vsel %vm721_vm10, %v1124_v3, %v1098_v2  ;;  %v1112_v5 = vsel %vm721_vm10, %v1108_v47, %v1067_v60 }
 0x364   : > { %v1053_v6 = vpop.permute.xlu1 %1052  ;;  %1322 = vmatprep.mubr.bf16.mxu0 %v1128_v4 }
 0x365   : > { %1323 = vmatmul.mubr.bf16.vlgmr.msra.gmra.mrb[20].mxu0 %v1112_v5  ;;  %v1106_v1 = vsel %vm465_vm2, %v2410_v11, %v1053_v6  ;;  %v2043_v11 = vld [vmem:[%s2566_s7 + $0x80] sm:$0xff]  }
 0x366   : > { %v1088_v8 = vpop.permute.xlu0 %1087  ;;  %1972 = vmatpush3.bf16.msra.mxu0 %v2043_v11  ;;  %v2076_v11 = vmov 0  }
 0x367   : > { %v1126_v10 = vsel %vm522_vm4, %v1122_v9, %v1088_v8  ;;  %1973 = vmatprep.subr.bf16.mxu0 %v2072_v19 }
 0x368   : > { %v1062_v7 = vpop.permute.xlu1 %1061 }
 0x369   : > { %v1110_v15 = vsel %vm522_vm4, %v1106_v1, %v1062_v7 }
 0x36a   : > { %v1100_v12 = vpop.permute.xlu0 %1099  ;;  %1974 = vmatpush3.bf16.msra.mxu0 %v2044_v22 }
 0x36b   : > { %v1131_v14 = vsel %vm721_vm10, %v1126_v10, %v1100_v12 }
 0x36c   : > { %v1069_v17 = vpop.permute.xlu1 %1068  ;;  %1330 = vmatprep.mubr.bf16.mxu0 %v1131_v14 }
 0x36d   : > { %v1115_v46 = vsel %vm721_vm10, %v1110_v15, %v1069_v17 }
 0x36e   : > { %1331 = vmatmul.mubr.bf16.gmra.mrb[24].mxu0 %v1115_v46 }
 0x36f   : > { %1975 = vmatprep.mubr.msk.bf16.mxu0 %vm2073_vm5, %v2072_v19  ;;  %v2049_v19 = vld [vmem:[%s2566_s7 + $0x50] sm:$0xff]  }
 0x370   : > { %1910 = vmatprep.subr.bf16.mxu1 %v2049_v19 }
 0x371   : > { %1911 = vmatpush3.bf16.msra.mxu1 %v2050_v27 }
 0x372   : > { %1912 = vmatprep.subr.bf16.mxu1 %v2051_v28 }
 0x375   : > { %1913 = vmatpush3.bf16.msra.mxu1 %v2052_v30 }
 0x376   : > { %1914 = vmatprep.subr.bf16.mxu1 %v2053_v31 }
 0x379   : > { %1915 = vmatpush3.bf16.msra.mxu1 %v2054_v13 }
 0x37a   : > { %1916 = vmatprep.subr.bf16.mxu1 %v2055_v32 }
 0x37d   : > { %1917 = vmatpush3.bf16.msra.mxu1 %v2056_v29 }
 0x37e   : > { %1918 = vmatprep.subr.bf16.mxu1 %v2057_v39 }
 0x381   : > { %1919 = vmatpush3.bf16.msra.mxu1 %v2058_v44 }
 0x382   : > { %1920 = vmatprep.subr.bf16.mxu1 %v2059_v48 }
 0x385   : > { %1921 = vmatpush3.bf16.msra.mxu1 %v2060_v55 }
 0x3c2   : > { %v2466_v18 = vpop.f32.mrb[12].mxu1 }
 0x3c3   : > { %v1372_v16 = vpop.f32.mrb[13].mxu1 }
 0x3c4   : > { %v1970_v20 = vpop.f32.mrb[14].mxu1 }
 0x3c5   : > { %v1375_v21 = vpop.f32.mrb[15].mxu1 }
 0x438   : > { %v1890_v33 = vpop.f32.mrb[20].mxu0 }
 0x439   : > { %v1891_v35 = vpop.f32.mrb[21].mxu0 }
 0x43a   : > { %v1892_v36 = vadd.f32 %v1891_v35, %v1890_v33  ;;  %v1893_v37 = vpop.f32.mrb[22].mxu0 }
 0x43b   : > { %v1894_v38 = vpop.f32.mrb[23].mxu0 }
 0x43c   : > { %v1325_v40 = vadd.f32 %v1892_v36, %v1785_v34  ;;  %v1895_v41 = vadd.f32 %v1894_v38, %v1893_v37 }
 0x43e   : > { %v1373_v42 = vadd.f32 %v1372_v16, %v1325_v40  ;;  %v1328_v43 = vadd.f32 %v1895_v41, %v1785_v34 }
 0x440   : > { %v1376_v45 = vadd.f32 %v1375_v21, %v1328_v43  ;;  %v1386_v50 = vmax.f32 %v1373_v42, 0.0 }
 0x441   : > { %v1896_v49 = vpop.f32.mrb[24].mxu0 }
 0x442   : > { %v1387_v51 = vmax.f32 %v1376_v45, 0.0  ;;  %v1897_v52 = vpop.f32.mrb[25].mxu0 }
 0x443   : > { %v1898_v53 = vadd.f32 %v1897_v52, %v1896_v49  ;;  %v1899_v54 = vpop.f32.mrb[26].mxu0 }
 0x444   : > { %v1389_v56 = vpack.c.bf16 %v1387_v51, %v1386_v50  ;;  %v1900_v57 = vpop.f32.mrb[27].mxu0 }
 0x445   : > { %v1333_v58 = vadd.f32 %v1898_v53, %v1785_v34 }
 0x446   : > { %v1404_v59 = vrot.slane %v1389_v56, 5  ;;  %v1392_v60 = vshrl.u32 %v1389_v56, 16  ;;  %v1397_v63 = vrot.slane %v1389_v56, 1  ;;  %v1400_v2 = vrot.slane %v1389_v56, 4 }
 0x447   : > { %v1381_v61 = vadd.f32 %v2466_v18, %v1333_v58 }
 0x448   : > { %1405 = vrot.lane.b32.xlu0 %v1404_v59, %s2069_s22  ;;  %1394 = vrot.lane.b32.xlu1 %v1392_v60, %s2069_s22  ;;  %v1403_v7 = vrot.slane %v1392_v60, 4 }
 0x449   : > { %v1388_v62 = vmax.f32 %v1381_v61, 0.0 }
 0x44b   : > { %v1390_v0 = vpack.c.bf16 %v1388_v62, %v1388_v62 }
 0x44c   : > { %1398 = vrot.lane.b32.xlu1 %v1397_v63, %s2074_s27 }
 0x44d   : > { %1408 = vrot.lane.b32.xlu0 %v1390_v0, %s2074_s27  ;;  %v1415_v47 = vrot.slane %v1390_v0, 1  ;;  %v1411_v3 = vshrl.u32 %v1390_v0, 16 }
 0x44f   : > { %1976 = vmatmul.mubr.msk.bf16.vlgmr.msra.gmra.mrb[28].mxu0 %vm465_vm2, %v1415_v47 }
 0x450   : > { %1401 = vrot.lane.b32.xlu1 %v1400_v2, %s2075_s13 }
 0x451   : > { %1413 = vrot.lane.b32.xlu0 %v1411_v3, %s2075_s13  ;;  %s334_s13 = scalar_lea.vmem %s2568_s9, %s1743_s16 }
 0x452   : > { %1674 = vst.msk [vmem:[%s334_s13 + $0x4] sm:$0xf] %vm1667_vm11, %v2076_v11  ;;  %1675 = vst.msk [vmem:[%s334_s13 + $0x8] sm:$0xf] %vm1667_vm11, %v2076_v11  ;;  %v1664_v31 = vld [vmem:[%s334_s13] sm:$0x1] }
 0x453   : > { %1676 = vst.msk [vmem:[%s334_s13 + $0xc] sm:$0xf] %vm1667_vm11, %v2076_v11  ;;  %1677 = vst.msk [vmem:[%s334_s13 + $0x10] sm:$0xf] %vm1667_vm11, %v2076_v11 }
 0x454   : > { %1678 = vst.msk [vmem:[%s334_s13 + $0x14] sm:$0xf] %vm1667_vm11, %v2076_v11  ;;  %1679 = vst.msk [vmem:[%s334_s13 + $0x18] sm:$0xf] %vm1667_vm11, %v2076_v11 }
 0x455   : > { %1680 = vst.msk [vmem:[%s334_s13 + $0x1c] sm:$0xf] %vm1667_vm11, %v2076_v11 }
 0x4ba   : > { %v1395_v4 = vpop.permute.xlu1 %1394  ;;  %v1406_v5 = vpop.permute.xlu0 %1405 }
 0x4bb   : > { %v1425_v9 = vsel %vm465_vm2, %v1403_v7, %v1406_v5  ;;  %v1417_v12 = vsel %vm465_vm2, %v1389_v56, %v1395_v4 }
 0x4be   : > { %v1399_v6 = vpop.permute.xlu1 %1398 }
 0x4bf   : > { %v1409_v8 = vpop.permute.xlu0 %1408  ;;  %v1419_v15 = vsel %vm522_vm4, %v1417_v12, %v1399_v6 }
 0x4c0   : > { %v1427_v1 = vsel %vm522_vm4, %v1425_v9, %v1409_v8 }
 0x4c2   : > { %v1402_v10 = vpop.permute.xlu1 %1401 }
 0x4c3   : > { %v1414_v14 = vpop.permute.xlu0 %1413  ;;  %v1421_v46 = vsel %vm721_vm10, %v1419_v15, %v1402_v10 }
 0x4c4   : > { %v1429_v17 = vsel %vm721_vm10, %v1427_v1, %v1414_v14 }
 0x4c5   : > { %1611 = vmatprep.mubr.bf16.mxu1 %v1429_v17 }
 0x4c6   : > { %1612 = vmatmul.mubr.bf16.vlgmr.msra.gmra.mrb[16].mxu1 %v1421_v46 }
 0x522   : > { %v1653_v18 = vpop.f32.mrb[28].mxu0 }
 0x523   : > { %v1977_v16 = vpop.f32.mrb[29].mxu0 }
 0x524   : > { %v1656_v20 = vpop.f32.mrb[30].mxu0 }
 0x525   : > { %v1978_v21 = vpop.f32.mrb[31].mxu0 }
 0x599   : > { %v1922_v22 = vpop.f32.mrb[16].mxu1 }
 0x59a   : > { %v1923_v24 = vpop.f32.mrb[17].mxu1 }
 0x59b   : > { %v1924_v25 = vadd.f32 %v1923_v24, %v1922_v22  ;;  %v1925_v26 = vpop.f32.mrb[18].mxu1 }
 0x59c   : > { %v1926_v19 = vpop.f32.mrb[19].mxu1 }
 0x59d   : > { %v1614_v27 = vadd.f32 %v1924_v25, %v1467_v23 }
 0x59f   : > { %v1654_v28 = vadd.f32 %v1653_v18, %v1614_v27 }
 0x5a1   : > { %v1659_v30 = vmax.f32 %v1654_v28, 0.0 }
 0x5a3   : > { %v1660_v13 = vpack.c.bf16 %v1659_v30, %v1659_v30 }
 0x5a5   : > { %v1665_v32 = vsel %vm1663_vm14, %v1660_v13, %v1664_v31 }
 0x5a6   : > { %1666 = vst [vmem:[%s334_s13] sm:$0x1] %v1665_v32 }
 0x5ad   : > { %v1670_v33 = vld [vmem:[%s334_s13] sm:$0xf] }
 0x5ae   : > { %v1671_v34 = vsel %vm1669_vm0, 0, %v1670_v33 }
 0x5af   : > { %1672 = vst [vmem:[%s334_s13] sm:$0xf] %v1671_v34 }
 0x5b0 PF: > { %s19_s30 = sadd.s32 1, %s2067_s30  }
 0x5b1   : > { %p16_p4 = scmp.ge.s32.totalorder %s19_s30, 4  }
 0x5b3   :  { %18 = sbr.rel (!%p16_p4) target bundleno = 1 (0x1), region = 86 }

</bundles_post_ra>
